<compile_context>
chip_gen: v7x
topology: tpu7x:2x2x1
jax: 0.10.0
libtpu: 0.0.40
codegen_flags: <defaults>
</compile_context>

<pallas_src>
import functools
import math

import jax
import jax.numpy as jnp
from jax.experimental import pallas as pl
from jax.experimental.pallas import tpu as pltpu

NEG_INF = -1e30


def _xattn_kernel(audio_ref, score_ref, bias_ref,
                  wqkv_ref, bqkv_ref, wo_ref, bo_ref,
                  out_ref, *, n_heads):
    Bt, Lq, H = audio_ref.shape
    _, Lk, _ = score_ref.shape

    # Flatten the batch block into the matmul M dimension for the projections
    # (Lq/Lk are multiples of 8 here, so this is a sublane-aligned relabel).
    audio = audio_ref[...].reshape(Bt * Lq, H)
    score = score_ref[...].reshape(Bt * Lk, H)
    bias = bias_ref[...]                                  # (Bt, 1, Lk) additive mask bias

    accs = [jnp.zeros((Lq, H), jnp.float32) for _ in range(Bt)]

    for h in range(n_heads):
        # Per-head fused projections; 1/sqrt(dh) already folded into q weights.
        qh = jnp.dot(audio, wqkv_ref[h],
                     preferred_element_type=jnp.float32) + bqkv_ref[h]            # (Bt*Lq, dh)
        kh = jnp.dot(score, wqkv_ref[n_heads + h],
                     preferred_element_type=jnp.float32) + bqkv_ref[n_heads + h]  # (Bt*Lk, dh)
        vh = jnp.dot(score, wqkv_ref[2 * n_heads + h],
                     preferred_element_type=jnp.float32) + bqkv_ref[2 * n_heads + h]
        woh = wo_ref[h]                                    # (dh, H)

        for bt in range(Bt):
            qb = qh[bt * Lq:(bt + 1) * Lq, :]              # sublane-aligned row slices
            kb = kh[bt * Lk:(bt + 1) * Lk, :]
            vb = vh[bt * Lk:(bt + 1) * Lk, :]
            s = jax.lax.dot_general(qb, kb, (((1,), (1,)), ((), ())),
                                    preferred_element_type=jnp.float32)           # (Lq, Lk)
            s = s + bias[bt]                               # key padding (additive)
            m = jnp.max(s, axis=-1, keepdims=True)
            p = jnp.exp(s - m)
            denom = jnp.sum(p, axis=-1, keepdims=True)
            # approx=True (EUP vrcp) also works; exact recip kept to stay safely
            # inside the 1e-4 reference tolerance.
            attn = p * pl.reciprocal(denom, approx=False)
            oh = jnp.dot(attn, vb, preferred_element_type=jnp.float32)            # (Lq, dh)
            # Per-head out-projection accumulate (replaces concat + single matmul).
            accs[bt] = accs[bt] + jnp.dot(oh, woh,
                                          preferred_element_type=jnp.float32)

    bo = bo_ref[...]                                       # (1, H)
    for bt in range(Bt):
        out_ref[bt] = (accs[bt] + bo).astype(out_ref.dtype)


def cross_attention_aligner_layer(score_embs, audio_embs, params, x_attn_mask=None,
                                  *, n_heads, batch_block=None):
    """score_embs: (B, Lk, H), audio_embs: (B, Lq, H), x_attn_mask: (B, Lk) bool."""
    B, Lk, H = score_embs.shape
    _, Lq, _ = audio_embs.shape
    assert H % n_heads == 0
    dh = H // n_heads

    if batch_block is None:
        # Batch as much as possible per grid step while keeping >= 2 grid steps
        # (v7x has 2 TensorCores and the batch axis is marked "parallel").
        batch_block = B // 2 if (B >= 2 and B % 2 == 0) else 1
    assert B % batch_block == 0
    grid = (B // batch_block,)

    # Additive key-padding bias, computed once outside the kernel.
    if x_attn_mask is None:
        bias = jnp.zeros((B, 1, Lk), jnp.float32)
    else:
        bias = jnp.where(x_attn_mask.reshape(B, 1, Lk),
                         NEG_INF, 0.0).astype(jnp.float32)

    # ---- Fuse q_emb/k_emb/v_emb with the MHA in-projections; split per head. ----
    p32 = {k: jnp.asarray(v, jnp.float32) for k, v in params.items()}
    scale = 1.0 / math.sqrt(dh)

    def fuse(w_e, b_e, w_i, b_i, s=1.0):
        W = (p32[w_e].T @ p32[w_i].T) * s                      # x @ W == in_proj(emb(x)) linear part
        bvec = (p32[b_e] @ p32[w_i].T + p32[b_i]) * s          # fused bias
        Wh = W.reshape(H, n_heads, dh).transpose(1, 0, 2)      # (nh, H, dh)
        bh = bvec.reshape(n_heads, 1, dh)                      # (nh, 1, dh)
        return Wh, bh

    wq, bq = fuse('wq_e', 'bq_e', 'wq_i', 'bq_i', scale)       # scale folded into q
    wk, bk = fuse('wk_e', 'bk_e', 'wk_i', 'bk_i')
    wv, bv = fuse('wv_e', 'bv_e', 'wv_i', 'bv_i')
    wqkv = jnp.concatenate([wq, wk, wv], axis=0)               # (3*nh, H, dh)
    bqkv = jnp.concatenate([bq, bk, bv], axis=0)               # (3*nh, 1, dh)
    wo = p32['wo'].T.reshape(n_heads, dh, H)                   # (nh, dh, H)
    bo = p32['bo'].reshape(1, H)

    kernel = functools.partial(_xattn_kernel, n_heads=n_heads)
    full3 = lambda i: (0, 0, 0)

    return pl.pallas_call(
        kernel,
        out_shape=jax.ShapeDtypeStruct((B, Lq, H), audio_embs.dtype),
        grid=grid,
        in_specs=[
            pl.BlockSpec((batch_block, Lq, H), lambda i: (i, 0, 0)),   # audio_embs
            pl.BlockSpec((batch_block, Lk, H), lambda i: (i, 0, 0)),   # score_embs
            pl.BlockSpec((batch_block, 1, Lk), lambda i: (i, 0, 0)),   # mask bias
            pl.BlockSpec((3 * n_heads, H, dh), full3),                 # fused q/k/v weights
            pl.BlockSpec((3 * n_heads, 1, dh), full3),                 # fused q/k/v biases
            pl.BlockSpec((n_heads, dh, H), full3),                     # out-proj weight (per head)
            pl.BlockSpec((1, H), lambda i: (0, 0)),                    # out-proj bias
        ],
        out_specs=pl.BlockSpec((batch_block, Lq, H), lambda i: (i, 0, 0)),
        compiler_params=pltpu.CompilerParams(
            dimension_semantics=("parallel",)),
    )(audio_embs, score_embs, bias, wqkv, bqkv, wo, bo)


def _reference(score_embs, audio_embs, params, x_attn_mask, n_heads):
    """Pure-JAX reference implementing the same eval-mode forward."""
    H = score_embs.shape[-1]
    dh = H // n_heads
    p = {k: jnp.asarray(v, jnp.float32) for k, v in params.items()}
    q0 = audio_embs @ p['wq_e'].T + p['bq_e']
    k0 = score_embs @ p['wk_e'].T + p['bk_e']
    v0 = score_embs @ p['wv_e'].T + p['bv_e']
    q = q0 @ p['wq_i'].T + p['bq_i']
    k = k0 @ p['wk_i'].T + p['bk_i']
    v = v0 @ p['wv_i'].T + p['bv_i']
    B, Lq, _ = q.shape
    Lk = k.shape[1]
    qh = q.reshape(B, Lq, n_heads, dh).transpose(0, 2, 1, 3)
    kh = k.reshape(B, Lk, n_heads, dh).transpose(0, 2, 1, 3)
    vh = v.reshape(B, Lk, n_heads, dh).transpose(0, 2, 1, 3)
    s = jnp.einsum('bhqd,bhkd->bhqk', qh, kh) / math.sqrt(dh)
    if x_attn_mask is not None:
        s = jnp.where(x_attn_mask[:, None, None, :], NEG_INF, s)
    attn = jax.nn.softmax(s, axis=-1)
    o = jnp.einsum('bhqk,bhkd->bhqd', attn, vh)
    o = o.transpose(0, 2, 1, 3).reshape(B, Lq, H)
    return o @ p['wo'].T + p['bo']


def _init_params(key, hid_dim):
    names = ['wq_e', 'bq_e', 'wk_e', 'bk_e', 'wv_e', 'bv_e',
             'wq_i', 'bq_i', 'wk_i', 'bk_i', 'wv_i', 'bv_i',
             'wo', 'bo']
    keys = jax.random.split(key, len(names))
    params = {}
    for k, name in zip(keys, names):
        if name.startswith('w'):
            shape = (hid_dim, hid_dim)      # PyTorch Linear (out, in) convention
        else:
            shape = (hid_dim,)
        params[name] = 0.1 * jax.random.normal(k, shape, jnp.float32)
    return params


if __name__ == "__main__":
    B = 2                 # bsz
    MAX_EVENTS = 8        # max_num_events (key/value length)
    AUDIO_LEN = 16        # audio_length   (query length)
    HID = 32              # hid_dim
    N_HEADS = 4

    root = jax.random.PRNGKey(0)
    k_score, k_audio, k_params = jax.random.split(root, 3)

    score_embs = jax.random.normal(k_score, (B, MAX_EVENTS, HID), jnp.float32)
    audio_embs = jax.random.normal(k_audio, (B, AUDIO_LEN, HID), jnp.float32)
    params = _init_params(k_params, HID)

    # key_padding_mask: True = this score event is padding (ignored).
    x_attn_mask = jnp.zeros((B, MAX_EVENTS), bool)
    x_attn_mask = x_attn_mask.at[0, -2:].set(True).at[1, -1:].set(True)

    out = cross_attention_aligner_layer(score_embs, audio_embs, params,
                                        x_attn_mask, n_heads=N_HEADS)
    out = jax.block_until_ready(out)

    ref = _reference(score_embs, audio_embs, params, x_attn_mask, N_HEADS)
    assert out.shape == (B, AUDIO_LEN, HID)
    assert jnp.allclose(out, ref, atol=1e-4, rtol=1e-4), "mismatch vs JAX reference"

    print("KERNEL_OK")
</pallas_src>

<mosaic_0001>
module attributes {stable_mosaic.version = 11 : i64} {
  func.func @_xattn_kernel(%arg0: i32, %arg1: memref<1x16x32xf32, #tpu.memory_space<vmem>>, %arg2: memref<1x8x32xf32, #tpu.memory_space<vmem>>, %arg3: memref<1x1x8xf32, #tpu.memory_space<vmem>>, %arg4: memref<12x32x8xf32, #tpu.memory_space<vmem>>, %arg5: memref<12x1x8xf32, #tpu.memory_space<vmem>>, %arg6: memref<4x8x32xf32, #tpu.memory_space<vmem>>, %arg7: memref<1x32xf32, #tpu.memory_space<vmem>>, %arg8: memref<1x16x32xf32, #tpu.memory_space<vmem>>) attributes {dimension_semantics = [#tpu.dimension_semantics<parallel>], iteration_bounds = array<i64: 2>, scalar_prefetch = 0 : i64, scratch_operands = 0 : i64, tpu.core_type = #tpu.core_type<tc>, window_params = [{transform_indices = @transform_0, window_bounds = array<i64: 1, 16, 32>}, {transform_indices = @transform_1, window_bounds = array<i64: 1, 8, 32>}, {transform_indices = @transform_2, window_bounds = array<i64: 1, 1, 8>}, {pipeline_mode = #tpu.pipeline_mode<synchronous>, transform_indices = @transform_3, window_bounds = array<i64: 12, 32, 8>}, {pipeline_mode = #tpu.pipeline_mode<synchronous>, transform_indices = @transform_4, window_bounds = array<i64: 12, 1, 8>}, {pipeline_mode = #tpu.pipeline_mode<synchronous>, transform_indices = @transform_5, window_bounds = array<i64: 4, 8, 32>}, {pipeline_mode = #tpu.pipeline_mode<synchronous>, transform_indices = @transform_6, window_bounds = array<i64: 1, 32>}, {transform_indices = @transform_7, window_bounds = array<i64: 1, 16, 32>}]} {
    %c0 = arith.constant 0 : index
    %c0_0 = arith.constant 0 : index
    %c0_1 = arith.constant 0 : index
    %0 = vector.load %arg1[%c0, %c0_0, %c0_1] : memref<1x16x32xf32, #tpu.memory_space<vmem>>, vector<1x16x32xf32>
    %1 = vector.shape_cast %0 : vector<1x16x32xf32> to vector<16x32xf32>
    %c0_2 = arith.constant 0 : index
    %c0_3 = arith.constant 0 : index
    %c0_4 = arith.constant 0 : index
    %2 = vector.load %arg2[%c0_2, %c0_3, %c0_4] : memref<1x8x32xf32, #tpu.memory_space<vmem>>, vector<1x8x32xf32>
    %3 = vector.shape_cast %2 : vector<1x8x32xf32> to vector<8x32xf32>
    %c0_5 = arith.constant 0 : index
    %c0_6 = arith.constant 0 : index
    %c0_7 = arith.constant 0 : index
    %4 = vector.load %arg3[%c0_5, %c0_6, %c0_7] : memref<1x1x8xf32, #tpu.memory_space<vmem>>, vector<1x1x8xf32>
    %cst = arith.constant 0.000000e+00 : f32
    %5 = vector.broadcast %cst : f32 to vector<16x32xf32>
    %c0_8 = arith.constant 0 : index
    %c0_9 = arith.constant 0 : index
    %c0_10 = arith.constant 0 : index
    %6 = vector.load %arg4[%c0_8, %c0_9, %c0_10] : memref<12x32x8xf32, #tpu.memory_space<vmem>>, vector<1x32x8xf32>
    %7 = vector.shape_cast %6 : vector<1x32x8xf32> to vector<32x8xf32>
    %cst_11 = arith.constant dense<0.000000e+00> : vector<16x8xf32>
    %8 = tpu.matmul %1, %7, %cst_11 {dimension_numbers = #tpu.dot_dimension_numbers<[1], [0], [0], [1], [0, 0, 1, 1], [], []>} : vector<16x32xf32>, vector<32x8xf32>, vector<16x8xf32> -> vector<16x8xf32>
    %c0_12 = arith.constant 0 : index
    %c0_13 = arith.constant 0 : index
    %c0_14 = arith.constant 0 : index
    %9 = vector.load %arg5[%c0_12, %c0_13, %c0_14] : memref<12x1x8xf32, #tpu.memory_space<vmem>>, vector<1x1x8xf32>
    %10 = vector.shape_cast %9 : vector<1x1x8xf32> to vector<1x8xf32>
    %11 = vector.broadcast %10 : vector<1x8xf32> to vector<16x8xf32>
    %12 = arith.addf %8, %11 : vector<16x8xf32>
    %c4 = arith.constant 4 : index
    %c0_15 = arith.constant 0 : index
    %c0_16 = arith.constant 0 : index
    %13 = vector.load %arg4[%c4, %c0_15, %c0_16] : memref<12x32x8xf32, #tpu.memory_space<vmem>>, vector<1x32x8xf32>
    %14 = vector.shape_cast %13 : vector<1x32x8xf32> to vector<32x8xf32>
    %cst_17 = arith.constant dense<0.000000e+00> : vector<8x8xf32>
    %15 = tpu.matmul %3, %14, %cst_17 {dimension_numbers = #tpu.dot_dimension_numbers<[1], [0], [0], [1], [0, 0, 1, 1], [], []>} : vector<8x32xf32>, vector<32x8xf32>, vector<8x8xf32> -> vector<8x8xf32>
    %c4_18 = arith.constant 4 : index
    %c0_19 = arith.constant 0 : index
    %c0_20 = arith.constant 0 : index
    %16 = vector.load %arg5[%c4_18, %c0_19, %c0_20] : memref<12x1x8xf32, #tpu.memory_space<vmem>>, vector<1x1x8xf32>
    %17 = vector.shape_cast %16 : vector<1x1x8xf32> to vector<1x8xf32>
    %18 = vector.broadcast %17 : vector<1x8xf32> to vector<8x8xf32>
    %19 = arith.addf %15, %18 : vector<8x8xf32>
    %c8 = arith.constant 8 : index
    %c0_21 = arith.constant 0 : index
    %c0_22 = arith.constant 0 : index
    %20 = vector.load %arg4[%c8, %c0_21, %c0_22] : memref<12x32x8xf32, #tpu.memory_space<vmem>>, vector<1x32x8xf32>
    %21 = vector.shape_cast %20 : vector<1x32x8xf32> to vector<32x8xf32>
    %cst_23 = arith.constant dense<0.000000e+00> : vector<8x8xf32>
    %22 = tpu.matmul %3, %21, %cst_23 {dimension_numbers = #tpu.dot_dimension_numbers<[1], [0], [0], [1], [0, 0, 1, 1], [], []>} : vector<8x32xf32>, vector<32x8xf32>, vector<8x8xf32> -> vector<8x8xf32>
    %c8_24 = arith.constant 8 : index
    %c0_25 = arith.constant 0 : index
    %c0_26 = arith.constant 0 : index
    %23 = vector.load %arg5[%c8_24, %c0_25, %c0_26] : memref<12x1x8xf32, #tpu.memory_space<vmem>>, vector<1x1x8xf32>
    %24 = vector.shape_cast %23 : vector<1x1x8xf32> to vector<1x8xf32>
    %25 = vector.broadcast %24 : vector<1x8xf32> to vector<8x8xf32>
    %26 = arith.addf %22, %25 : vector<8x8xf32>
    %c0_27 = arith.constant 0 : index
    %c0_28 = arith.constant 0 : index
    %c0_29 = arith.constant 0 : index
    %27 = vector.load %arg6[%c0_27, %c0_28, %c0_29] : memref<4x8x32xf32, #tpu.memory_space<vmem>>, vector<1x8x32xf32>
    %28 = vector.shape_cast %27 : vector<1x8x32xf32> to vector<8x32xf32>
    %cst_30 = arith.constant dense<0.000000e+00> : vector<16x8xf32>
    %29 = tpu.matmul %12, %19, %cst_30 {dimension_numbers = #tpu.dot_dimension_numbers<[1], [1], [0], [0], [0, 0, 1, 0], [], []>} : vector<16x8xf32>, vector<8x8xf32>, vector<16x8xf32> -> vector<16x8xf32>
    %30 = vector.shape_cast %4 : vector<1x1x8xf32> to vector<1x8xf32>
    %31 = vector.broadcast %30 : vector<1x8xf32> to vector<16x8xf32>
    %32 = arith.addf %29, %31 : vector<16x8xf32>
    %cst_31 = arith.constant dense<0xFF800000> : vector<16xf32>
    %33 = vector.multi_reduction <maximumf>, %32, %cst_31 [1] : vector<16x8xf32> to vector<16xf32>
    %34 = vector.shape_cast %33 : vector<16xf32> to vector<16x1xf32>
    %35 = vector.broadcast %34 : vector<16x1xf32> to vector<16x8xf32>
    %36 = arith.subf %32, %35 : vector<16x8xf32>
    %37 = math.exp %36 : vector<16x8xf32>
    %cst_32 = arith.constant dense<0.000000e+00> : vector<16xf32>
    %38 = vector.multi_reduction <add>, %37, %cst_32 [1] : vector<16x8xf32> to vector<16xf32>
    %39 = vector.shape_cast %38 : vector<16xf32> to vector<16x1xf32>
    %40 = tpu.reciprocal %39 : vector<16x1xf32> -> vector<16x1xf32>
    %41 = vector.broadcast %40 : vector<16x1xf32> to vector<16x8xf32>
    %42 = arith.mulf %37, %41 : vector<16x8xf32>
    %cst_33 = arith.constant dense<0.000000e+00> : vector<16x8xf32>
    %43 = tpu.matmul %42, %26, %cst_33 {dimension_numbers = #tpu.dot_dimension_numbers<[1], [0], [0], [1], [0, 0, 1, 1], [], []>} : vector<16x8xf32>, vector<8x8xf32>, vector<16x8xf32> -> vector<16x8xf32>
    %cst_34 = arith.constant dense<0.000000e+00> : vector<16x32xf32>
    %44 = tpu.matmul %43, %28, %cst_34 {dimension_numbers = #tpu.dot_dimension_numbers<[1], [0], [0], [1], [0, 0, 1, 1], [], []>} : vector<16x8xf32>, vector<8x32xf32>, vector<16x32xf32> -> vector<16x32xf32>
    %45 = arith.addf %5, %44 : vector<16x32xf32>
    %c1 = arith.constant 1 : index
    %c0_35 = arith.constant 0 : index
    %c0_36 = arith.constant 0 : index
    %46 = vector.load %arg4[%c1, %c0_35, %c0_36] : memref<12x32x8xf32, #tpu.memory_space<vmem>>, vector<1x32x8xf32>
    %47 = vector.shape_cast %46 : vector<1x32x8xf32> to vector<32x8xf32>
    %cst_37 = arith.constant dense<0.000000e+00> : vector<16x8xf32>
    %48 = tpu.matmul %1, %47, %cst_37 {dimension_numbers = #tpu.dot_dimension_numbers<[1], [0], [0], [1], [0, 0, 1, 1], [], []>} : vector<16x32xf32>, vector<32x8xf32>, vector<16x8xf32> -> vector<16x8xf32>
    %c1_38 = arith.constant 1 : index
    %c0_39 = arith.constant 0 : index
    %c0_40 = arith.constant 0 : index
    %49 = vector.load %arg5[%c1_38, %c0_39, %c0_40] : memref<12x1x8xf32, #tpu.memory_space<vmem>>, vector<1x1x8xf32>
    %50 = vector.shape_cast %49 : vector<1x1x8xf32> to vector<1x8xf32>
    %51 = vector.broadcast %50 : vector<1x8xf32> to vector<16x8xf32>
    %52 = arith.addf %48, %51 : vector<16x8xf32>
    %c5 = arith.constant 5 : index
    %c0_41 = arith.constant 0 : index
    %c0_42 = arith.constant 0 : index
    %53 = vector.load %arg4[%c5, %c0_41, %c0_42] : memref<12x32x8xf32, #tpu.memory_space<vmem>>, vector<1x32x8xf32>
    %54 = vector.shape_cast %53 : vector<1x32x8xf32> to vector<32x8xf32>
    %cst_43 = arith.constant dense<0.000000e+00> : vector<8x8xf32>
    %55 = tpu.matmul %3, %54, %cst_43 {dimension_numbers = #tpu.dot_dimension_numbers<[1], [0], [0], [1], [0, 0, 1, 1], [], []>} : vector<8x32xf32>, vector<32x8xf32>, vector<8x8xf32> -> vector<8x8xf32>
    %c5_44 = arith.constant 5 : index
    %c0_45 = arith.constant 0 : index
    %c0_46 = arith.constant 0 : index
    %56 = vector.load %arg5[%c5_44, %c0_45, %c0_46] : memref<12x1x8xf32, #tpu.memory_space<vmem>>, vector<1x1x8xf32>
    %57 = vector.shape_cast %56 : vector<1x1x8xf32> to vector<1x8xf32>
    %58 = vector.broadcast %57 : vector<1x8xf32> to vector<8x8xf32>
    %59 = arith.addf %55, %58 : vector<8x8xf32>
    %c9 = arith.constant 9 : index
    %c0_47 = arith.constant 0 : index
    %c0_48 = arith.constant 0 : index
    %60 = vector.load %arg4[%c9, %c0_47, %c0_48] : memref<12x32x8xf32, #tpu.memory_space<vmem>>, vector<1x32x8xf32>
    %61 = vector.shape_cast %60 : vector<1x32x8xf32> to vector<32x8xf32>
    %cst_49 = arith.constant dense<0.000000e+00> : vector<8x8xf32>
    %62 = tpu.matmul %3, %61, %cst_49 {dimension_numbers = #tpu.dot_dimension_numbers<[1], [0], [0], [1], [0, 0, 1, 1], [], []>} : vector<8x32xf32>, vector<32x8xf32>, vector<8x8xf32> -> vector<8x8xf32>
    %c9_50 = arith.constant 9 : index
    %c0_51 = arith.constant 0 : index
    %c0_52 = arith.constant 0 : index
    %63 = vector.load %arg5[%c9_50, %c0_51, %c0_52] : memref<12x1x8xf32, #tpu.memory_space<vmem>>, vector<1x1x8xf32>
    %64 = vector.shape_cast %63 : vector<1x1x8xf32> to vector<1x8xf32>
    %65 = vector.broadcast %64 : vector<1x8xf32> to vector<8x8xf32>
    %66 = arith.addf %62, %65 : vector<8x8xf32>
    %c1_53 = arith.constant 1 : index
    %c0_54 = arith.constant 0 : index
    %c0_55 = arith.constant 0 : index
    %67 = vector.load %arg6[%c1_53, %c0_54, %c0_55] : memref<4x8x32xf32, #tpu.memory_space<vmem>>, vector<1x8x32xf32>
    %68 = vector.shape_cast %67 : vector<1x8x32xf32> to vector<8x32xf32>
    %cst_56 = arith.constant dense<0.000000e+00> : vector<16x8xf32>
    %69 = tpu.matmul %52, %59, %cst_56 {dimension_numbers = #tpu.dot_dimension_numbers<[1], [1], [0], [0], [0, 0, 1, 0], [], []>} : vector<16x8xf32>, vector<8x8xf32>, vector<16x8xf32> -> vector<16x8xf32>
    %70 = vector.shape_cast %4 : vector<1x1x8xf32> to vector<1x8xf32>
    %71 = vector.broadcast %70 : vector<1x8xf32> to vector<16x8xf32>
    %72 = arith.addf %69, %71 : vector<16x8xf32>
    %cst_57 = arith.constant dense<0xFF800000> : vector<16xf32>
    %73 = vector.multi_reduction <maximumf>, %72, %cst_57 [1] : vector<16x8xf32> to vector<16xf32>
    %74 = vector.shape_cast %73 : vector<16xf32> to vector<16x1xf32>
    %75 = vector.broadcast %74 : vector<16x1xf32> to vector<16x8xf32>
    %76 = arith.subf %72, %75 : vector<16x8xf32>
    %77 = math.exp %76 : vector<16x8xf32>
    %cst_58 = arith.constant dense<0.000000e+00> : vector<16xf32>
    %78 = vector.multi_reduction <add>, %77, %cst_58 [1] : vector<16x8xf32> to vector<16xf32>
    %79 = vector.shape_cast %78 : vector<16xf32> to vector<16x1xf32>
    %80 = tpu.reciprocal %79 : vector<16x1xf32> -> vector<16x1xf32>
    %81 = vector.broadcast %80 : vector<16x1xf32> to vector<16x8xf32>
    %82 = arith.mulf %77, %81 : vector<16x8xf32>
    %cst_59 = arith.constant dense<0.000000e+00> : vector<16x8xf32>
    %83 = tpu.matmul %82, %66, %cst_59 {dimension_numbers = #tpu.dot_dimension_numbers<[1], [0], [0], [1], [0, 0, 1, 1], [], []>} : vector<16x8xf32>, vector<8x8xf32>, vector<16x8xf32> -> vector<16x8xf32>
    %cst_60 = arith.constant dense<0.000000e+00> : vector<16x32xf32>
    %84 = tpu.matmul %83, %68, %cst_60 {dimension_numbers = #tpu.dot_dimension_numbers<[1], [0], [0], [1], [0, 0, 1, 1], [], []>} : vector<16x8xf32>, vector<8x32xf32>, vector<16x32xf32> -> vector<16x32xf32>
    %85 = arith.addf %45, %84 : vector<16x32xf32>
    %c2 = arith.constant 2 : index
    %c0_61 = arith.constant 0 : index
    %c0_62 = arith.constant 0 : index
    %86 = vector.load %arg4[%c2, %c0_61, %c0_62] : memref<12x32x8xf32, #tpu.memory_space<vmem>>, vector<1x32x8xf32>
    %87 = vector.shape_cast %86 : vector<1x32x8xf32> to vector<32x8xf32>
    %cst_63 = arith.constant dense<0.000000e+00> : vector<16x8xf32>
    %88 = tpu.matmul %1, %87, %cst_63 {dimension_numbers = #tpu.dot_dimension_numbers<[1], [0], [0], [1], [0, 0, 1, 1], [], []>} : vector<16x32xf32>, vector<32x8xf32>, vector<16x8xf32> -> vector<16x8xf32>
    %c2_64 = arith.constant 2 : index
    %c0_65 = arith.constant 0 : index
    %c0_66 = arith.constant 0 : index
    %89 = vector.load %arg5[%c2_64, %c0_65, %c0_66] : memref<12x1x8xf32, #tpu.memory_space<vmem>>, vector<1x1x8xf32>
    %90 = vector.shape_cast %89 : vector<1x1x8xf32> to vector<1x8xf32>
    %91 = vector.broadcast %90 : vector<1x8xf32> to vector<16x8xf32>
    %92 = arith.addf %88, %91 : vector<16x8xf32>
    %c6 = arith.constant 6 : index
    %c0_67 = arith.constant 0 : index
    %c0_68 = arith.constant 0 : index
    %93 = vector.load %arg4[%c6, %c0_67, %c0_68] : memref<12x32x8xf32, #tpu.memory_space<vmem>>, vector<1x32x8xf32>
    %94 = vector.shape_cast %93 : vector<1x32x8xf32> to vector<32x8xf32>
    %cst_69 = arith.constant dense<0.000000e+00> : vector<8x8xf32>
    %95 = tpu.matmul %3, %94, %cst_69 {dimension_numbers = #tpu.dot_dimension_numbers<[1], [0], [0], [1], [0, 0, 1, 1], [], []>} : vector<8x32xf32>, vector<32x8xf32>, vector<8x8xf32> -> vector<8x8xf32>
    %c6_70 = arith.constant 6 : index
    %c0_71 = arith.constant 0 : index
    %c0_72 = arith.constant 0 : index
    %96 = vector.load %arg5[%c6_70, %c0_71, %c0_72] : memref<12x1x8xf32, #tpu.memory_space<vmem>>, vector<1x1x8xf32>
    %97 = vector.shape_cast %96 : vector<1x1x8xf32> to vector<1x8xf32>
    %98 = vector.broadcast %97 : vector<1x8xf32> to vector<8x8xf32>
    %99 = arith.addf %95, %98 : vector<8x8xf32>
    %c10 = arith.constant 10 : index
    %c0_73 = arith.constant 0 : index
    %c0_74 = arith.constant 0 : index
    %100 = vector.load %arg4[%c10, %c0_73, %c0_74] : memref<12x32x8xf32, #tpu.memory_space<vmem>>, vector<1x32x8xf32>
    %101 = vector.shape_cast %100 : vector<1x32x8xf32> to vector<32x8xf32>
    %cst_75 = arith.constant dense<0.000000e+00> : vector<8x8xf32>
    %102 = tpu.matmul %3, %101, %cst_75 {dimension_numbers = #tpu.dot_dimension_numbers<[1], [0], [0], [1], [0, 0, 1, 1], [], []>} : vector<8x32xf32>, vector<32x8xf32>, vector<8x8xf32> -> vector<8x8xf32>
    %c10_76 = arith.constant 10 : index
    %c0_77 = arith.constant 0 : index
    %c0_78 = arith.constant 0 : index
    %103 = vector.load %arg5[%c10_76, %c0_77, %c0_78] : memref<12x1x8xf32, #tpu.memory_space<vmem>>, vector<1x1x8xf32>
    %104 = vector.shape_cast %103 : vector<1x1x8xf32> to vector<1x8xf32>
    %105 = vector.broadcast %104 : vector<1x8xf32> to vector<8x8xf32>
    %106 = arith.addf %102, %105 : vector<8x8xf32>
    %c2_79 = arith.constant 2 : index
    %c0_80 = arith.constant 0 : index
    %c0_81 = arith.constant 0 : index
    %107 = vector.load %arg6[%c2_79, %c0_80, %c0_81] : memref<4x8x32xf32, #tpu.memory_space<vmem>>, vector<1x8x32xf32>
    %108 = vector.shape_cast %107 : vector<1x8x32xf32> to vector<8x32xf32>
    %cst_82 = arith.constant dense<0.000000e+00> : vector<16x8xf32>
    %109 = tpu.matmul %92, %99, %cst_82 {dimension_numbers = #tpu.dot_dimension_numbers<[1], [1], [0], [0], [0, 0, 1, 0], [], []>} : vector<16x8xf32>, vector<8x8xf32>, vector<16x8xf32> -> vector<16x8xf32>
    %110 = vector.shape_cast %4 : vector<1x1x8xf32> to vector<1x8xf32>
    %111 = vector.broadcast %110 : vector<1x8xf32> to vector<16x8xf32>
    %112 = arith.addf %109, %111 : vector<16x8xf32>
    %cst_83 = arith.constant dense<0xFF800000> : vector<16xf32>
    %113 = vector.multi_reduction <maximumf>, %112, %cst_83 [1] : vector<16x8xf32> to vector<16xf32>
    %114 = vector.shape_cast %113 : vector<16xf32> to vector<16x1xf32>
    %115 = vector.broadcast %114 : vector<16x1xf32> to vector<16x8xf32>
    %116 = arith.subf %112, %115 : vector<16x8xf32>
    %117 = math.exp %116 : vector<16x8xf32>
    %cst_84 = arith.constant dense<0.000000e+00> : vector<16xf32>
    %118 = vector.multi_reduction <add>, %117, %cst_84 [1] : vector<16x8xf32> to vector<16xf32>
    %119 = vector.shape_cast %118 : vector<16xf32> to vector<16x1xf32>
    %120 = tpu.reciprocal %119 : vector<16x1xf32> -> vector<16x1xf32>
    %121 = vector.broadcast %120 : vector<16x1xf32> to vector<16x8xf32>
    %122 = arith.mulf %117, %121 : vector<16x8xf32>
    %cst_85 = arith.constant dense<0.000000e+00> : vector<16x8xf32>
    %123 = tpu.matmul %122, %106, %cst_85 {dimension_numbers = #tpu.dot_dimension_numbers<[1], [0], [0], [1], [0, 0, 1, 1], [], []>} : vector<16x8xf32>, vector<8x8xf32>, vector<16x8xf32> -> vector<16x8xf32>
    %cst_86 = arith.constant dense<0.000000e+00> : vector<16x32xf32>
    %124 = tpu.matmul %123, %108, %cst_86 {dimension_numbers = #tpu.dot_dimension_numbers<[1], [0], [0], [1], [0, 0, 1, 1], [], []>} : vector<16x8xf32>, vector<8x32xf32>, vector<16x32xf32> -> vector<16x32xf32>
    %125 = arith.addf %85, %124 : vector<16x32xf32>
    %c3 = arith.constant 3 : index
    %c0_87 = arith.constant 0 : index
    %c0_88 = arith.constant 0 : index
    %126 = vector.load %arg4[%c3, %c0_87, %c0_88] : memref<12x32x8xf32, #tpu.memory_space<vmem>>, vector<1x32x8xf32>
    %127 = vector.shape_cast %126 : vector<1x32x8xf32> to vector<32x8xf32>
    %cst_89 = arith.constant dense<0.000000e+00> : vector<16x8xf32>
    %128 = tpu.matmul %1, %127, %cst_89 {dimension_numbers = #tpu.dot_dimension_numbers<[1], [0], [0], [1], [0, 0, 1, 1], [], []>} : vector<16x32xf32>, vector<32x8xf32>, vector<16x8xf32> -> vector<16x8xf32>
    %c3_90 = arith.constant 3 : index
    %c0_91 = arith.constant 0 : index
    %c0_92 = arith.constant 0 : index
    %129 = vector.load %arg5[%c3_90, %c0_91, %c0_92] : memref<12x1x8xf32, #tpu.memory_space<vmem>>, vector<1x1x8xf32>
    %130 = vector.shape_cast %129 : vector<1x1x8xf32> to vector<1x8xf32>
    %131 = vector.broadcast %130 : vector<1x8xf32> to vector<16x8xf32>
    %132 = arith.addf %128, %131 : vector<16x8xf32>
    %c7 = arith.constant 7 : index
    %c0_93 = arith.constant 0 : index
    %c0_94 = arith.constant 0 : index
    %133 = vector.load %arg4[%c7, %c0_93, %c0_94] : memref<12x32x8xf32, #tpu.memory_space<vmem>>, vector<1x32x8xf32>
    %134 = vector.shape_cast %133 : vector<1x32x8xf32> to vector<32x8xf32>
    %cst_95 = arith.constant dense<0.000000e+00> : vector<8x8xf32>
    %135 = tpu.matmul %3, %134, %cst_95 {dimension_numbers = #tpu.dot_dimension_numbers<[1], [0], [0], [1], [0, 0, 1, 1], [], []>} : vector<8x32xf32>, vector<32x8xf32>, vector<8x8xf32> -> vector<8x8xf32>
    %c7_96 = arith.constant 7 : index
    %c0_97 = arith.constant 0 : index
    %c0_98 = arith.constant 0 : index
    %136 = vector.load %arg5[%c7_96, %c0_97, %c0_98] : memref<12x1x8xf32, #tpu.memory_space<vmem>>, vector<1x1x8xf32>
    %137 = vector.shape_cast %136 : vector<1x1x8xf32> to vector<1x8xf32>
    %138 = vector.broadcast %137 : vector<1x8xf32> to vector<8x8xf32>
    %139 = arith.addf %135, %138 : vector<8x8xf32>
    %c11 = arith.constant 11 : index
    %c0_99 = arith.constant 0 : index
    %c0_100 = arith.constant 0 : index
    %140 = vector.load %arg4[%c11, %c0_99, %c0_100] : memref<12x32x8xf32, #tpu.memory_space<vmem>>, vector<1x32x8xf32>
    %141 = vector.shape_cast %140 : vector<1x32x8xf32> to vector<32x8xf32>
    %cst_101 = arith.constant dense<0.000000e+00> : vector<8x8xf32>
    %142 = tpu.matmul %3, %141, %cst_101 {dimension_numbers = #tpu.dot_dimension_numbers<[1], [0], [0], [1], [0, 0, 1, 1], [], []>} : vector<8x32xf32>, vector<32x8xf32>, vector<8x8xf32> -> vector<8x8xf32>
    %c11_102 = arith.constant 11 : index
    %c0_103 = arith.constant 0 : index
    %c0_104 = arith.constant 0 : index
    %143 = vector.load %arg5[%c11_102, %c0_103, %c0_104] : memref<12x1x8xf32, #tpu.memory_space<vmem>>, vector<1x1x8xf32>
    %144 = vector.shape_cast %143 : vector<1x1x8xf32> to vector<1x8xf32>
    %145 = vector.broadcast %144 : vector<1x8xf32> to vector<8x8xf32>
    %146 = arith.addf %142, %145 : vector<8x8xf32>
    %c3_105 = arith.constant 3 : index
    %c0_106 = arith.constant 0 : index
    %c0_107 = arith.constant 0 : index
    %147 = vector.load %arg6[%c3_105, %c0_106, %c0_107] : memref<4x8x32xf32, #tpu.memory_space<vmem>>, vector<1x8x32xf32>
    %148 = vector.shape_cast %147 : vector<1x8x32xf32> to vector<8x32xf32>
    %cst_108 = arith.constant dense<0.000000e+00> : vector<16x8xf32>
    %149 = tpu.matmul %132, %139, %cst_108 {dimension_numbers = #tpu.dot_dimension_numbers<[1], [1], [0], [0], [0, 0, 1, 0], [], []>} : vector<16x8xf32>, vector<8x8xf32>, vector<16x8xf32> -> vector<16x8xf32>
    %150 = vector.shape_cast %4 : vector<1x1x8xf32> to vector<1x8xf32>
    %151 = vector.broadcast %150 : vector<1x8xf32> to vector<16x8xf32>
    %152 = arith.addf %149, %151 : vector<16x8xf32>
    %cst_109 = arith.constant dense<0xFF800000> : vector<16xf32>
    %153 = vector.multi_reduction <maximumf>, %152, %cst_109 [1] : vector<16x8xf32> to vector<16xf32>
    %154 = vector.shape_cast %153 : vector<16xf32> to vector<16x1xf32>
    %155 = vector.broadcast %154 : vector<16x1xf32> to vector<16x8xf32>
    %156 = arith.subf %152, %155 : vector<16x8xf32>
    %157 = math.exp %156 : vector<16x8xf32>
    %cst_110 = arith.constant dense<0.000000e+00> : vector<16xf32>
    %158 = vector.multi_reduction <add>, %157, %cst_110 [1] : vector<16x8xf32> to vector<16xf32>
    %159 = vector.shape_cast %158 : vector<16xf32> to vector<16x1xf32>
    %160 = tpu.reciprocal %159 : vector<16x1xf32> -> vector<16x1xf32>
    %161 = vector.broadcast %160 : vector<16x1xf32> to vector<16x8xf32>
    %162 = arith.mulf %157, %161 : vector<16x8xf32>
    %cst_111 = arith.constant dense<0.000000e+00> : vector<16x8xf32>
    %163 = tpu.matmul %162, %146, %cst_111 {dimension_numbers = #tpu.dot_dimension_numbers<[1], [0], [0], [1], [0, 0, 1, 1], [], []>} : vector<16x8xf32>, vector<8x8xf32>, vector<16x8xf32> -> vector<16x8xf32>
    %cst_112 = arith.constant dense<0.000000e+00> : vector<16x32xf32>
    %164 = tpu.matmul %163, %148, %cst_112 {dimension_numbers = #tpu.dot_dimension_numbers<[1], [0], [0], [1], [0, 0, 1, 1], [], []>} : vector<16x8xf32>, vector<8x32xf32>, vector<16x32xf32> -> vector<16x32xf32>
    %165 = arith.addf %125, %164 : vector<16x32xf32>
    %c0_113 = arith.constant 0 : index
    %c0_114 = arith.constant 0 : index
    %166 = vector.load %arg7[%c0_113, %c0_114] : memref<1x32xf32, #tpu.memory_space<vmem>>, vector<1x32xf32>
    %167 = vector.broadcast %166 : vector<1x32xf32> to vector<16x32xf32>
    %168 = arith.addf %165, %167 : vector<16x32xf32>
    %c0_115 = arith.constant 0 : index
    %c0_116 = arith.constant 0 : index
    %c0_117 = arith.constant 0 : index
    %169 = vector.load %arg8[%c0_115, %c0_116, %c0_117] : memref<1x16x32xf32, #tpu.memory_space<vmem>>, vector<1x16x32xf32>
    %170 = vector.shape_cast %169 : vector<1x16x32xf32> to vector<16x32xf32>
    %171 = vector.shape_cast %168 : vector<16x32xf32> to vector<1x16x32xf32>
    tpu.vector_store %arg8[%c0_115, %c0_116, %c0_117], %171 {strides = array<i32>} : memref<1x16x32xf32, #tpu.memory_space<vmem>>, vector<1x16x32xf32>,
    return
  }
  func.func @transform_0(%arg0: i32) -> (i32, i32, i32) {
    %c0_i32 = arith.constant 0 : i32
    %c0_i32_0 = arith.constant 0 : i32
    %c0_i32_1 = arith.constant 0 : i32
    return %arg0, %c0_i32, %c0_i32_0 : i32, i32, i32
  }
  func.func @transform_1(%arg0: i32) -> (i32, i32, i32) {
    %c0_i32 = arith.constant 0 : i32
    %c0_i32_0 = arith.constant 0 : i32
    %c0_i32_1 = arith.constant 0 : i32
    return %arg0, %c0_i32, %c0_i32_0 : i32, i32, i32
  }
  func.func @transform_2(%arg0: i32) -> (i32, i32, i32) {
    %c0_i32 = arith.constant 0 : i32
    %c0_i32_0 = arith.constant 0 : i32
    %c0_i32_1 = arith.constant 0 : i32
    return %arg0, %c0_i32, %c0_i32_0 : i32, i32, i32
  }
  func.func @transform_3(%arg0: i32) -> (i32, i32, i32) {
    %c0_i32 = arith.constant 0 : i32
    %c0_i32_0 = arith.constant 0 : i32
    %c0_i32_1 = arith.constant 0 : i32
    %c0_i32_2 = arith.constant 0 : i32
    return %c0_i32, %c0_i32_0, %c0_i32_1 : i32, i32, i32
  }
  func.func @transform_4(%arg0: i32) -> (i32, i32, i32) {
    %c0_i32 = arith.constant 0 : i32
    %c0_i32_0 = arith.constant 0 : i32
    %c0_i32_1 = arith.constant 0 : i32
    %c0_i32_2 = arith.constant 0 : i32
    return %c0_i32, %c0_i32_0, %c0_i32_1 : i32, i32, i32
  }
  func.func @transform_5(%arg0: i32) -> (i32, i32, i32) {
    %c0_i32 = arith.constant 0 : i32
    %c0_i32_0 = arith.constant 0 : i32
    %c0_i32_1 = arith.constant 0 : i32
    %c0_i32_2 = arith.constant 0 : i32
    return %c0_i32, %c0_i32_0, %c0_i32_1 : i32, i32, i32
  }
  func.func @transform_6(%arg0: i32) -> (i32, i32) {
    %c0_i32 = arith.constant 0 : i32
    %c0_i32_0 = arith.constant 0 : i32
    %c0_i32_1 = arith.constant 0 : i32
    return %c0_i32, %c0_i32_0 : i32, i32
  }
  func.func @transform_7(%arg0: i32) -> (i32, i32, i32) {
    %c0_i32 = arith.constant 0 : i32
    %c0_i32_0 = arith.constant 0 : i32
    %c0_i32_1 = arith.constant 0 : i32
    return %arg0, %c0_i32, %c0_i32_0 : i32, i32, i32
  }
}

</mosaic_0001>

<bundles_post_ra>
// kernel: tpu_custom_call.1
= control target key start
LH: loop header
LB: loop body
LE: loop exit
PB: predicated region body
PF: predicated region fallthrough
CT: control target
= control target key end

     0   :  { %12 = vsyncpa [#allocation3], 0  ;;  %s3674_s0 = inlined_call_operand.vmem [shape: f32[2,16,32], index: 0, kind: input, shape index: {}]   ;;  %s3675_s1 = inlined_call_operand.vmem [shape: f32[2,8,32], index: 1, kind: input, shape index: {}]   ;;  %s3676_s2 = inlined_call_operand.vmem [shape: f32[2,1,8], index: 2, kind: input, shape index: {}]   ;;  %s3677_s3 = inlined_call_operand.vmem [shape: f32[12,32,8], index: 3, kind: input, shape index: {}]   ;;  %s3678_s4 = inlined_call_operand.vmem [shape: f32[12,1,8], index: 4, kind: input, shape index: {}]   ;;  %s3679_s5 = inlined_call_operand.vmem [shape: f32[4,8,32], index: 5, kind: input, shape index: {}]   ;;  %s3680_s6 = inlined_call_operand.vmem [shape: f32[1,32], index: 6, kind: input, shape index: {}]   ;;  %s3681_s7 = inlined_call_operand.hbm [shape: f32[2,16,32], index: 7, kind: output, shape index: {}]  }
   0x1   :  { %14 = vsyncpa [#allocation3 + $0x1], 0  ;;  %s3229_s24 = smov 0   ;;  %s3231_s25 = smov 0  }
   0x2   :  { %s3233_s26 = smov 0   ;;  %s3235_s27 = smov 0  }
   0x3 LB: > { %s3250_s28 = sadd.s32 4294967295, %s3181_s27   ;;  %s2534_s29 = sadd.s32 4294967294, %s3181_s27   ;;  %s3181_s27 = sphi %s3235_s27, %s3687_s27   ;;  %s3177_s26 = sphi %s3233_s26, %s3686_s26   ;;  %s3173_s25 = sphi %s3231_s25, %s3685_s25   ;;  %s3169_s24 = sphi %s3229_s24, %s3684_s24  }
   0x4   : > { %s3254_s30 = sadd.s32 1, %s3181_s27   ;;  %s189_s8 = sadd.s32 1, %s3177_s26 }
   0x5   : > { %s186_s9 = ssub.s32 %s3181_s27, %s3254_s30  ;;  %p199_p0 = scmp.ne.s32.totalorder %s3177_s26, %s3173_s25 }
   0x6   : > { %p187_p1 = scmp.eq.s32.totalorder %s186_s9, 0  ;;  %p200_p2 = scmp.eq.s32.totalorder %s3250_s28, 1 }
   0x7   : > { %p205_p3 = scmp.ne.s32.totalorder %s3173_s25, %s3169_s24  ;;  %p206_p4 = scmp.eq.s32.totalorder %s2534_s29, 1 }
   0x8   : > { %s3265_s10 = scalar_select %p187_p1, %s3177_s26, %s189_s8  }
   0x9   : > { %p3267_p5 = por %p200_p2, %p199_p0  ;;  %p3271_p6 = por %p206_p4, %p205_p3 }
   0xa   : > { %p2537_p7 = scmp.ge.s32.totalorder %s3181_s27, 1  ;;  %p257_p8 = scmp.lt.s32.totalorder %s3181_s27, 3 }
   0xc   : > { %p258_p9 = pnand %p2537_p7, %p257_p8 }
   0xd   : > { %v312_v0 = vld [vmem:[%s3677_s3] sm:$0xff] (!%p258_p9)  ;;  %v313_v1 = vld [vmem:[%s3677_s3 + $0x8] sm:$0xff] (!%p258_p9)  ;;  %v3183_v3 = vmov (!%p258_p9), 0.0|0.0   ;;  %v314_v6 = vld [vmem:[%s3677_s3 + $0x10] sm:$0xff] (!%p258_p9)  ;;  %vm3184_vm0 = vmmov (!%p258_p9), 0   ;;  %v3185_v8 = vmov (!%p258_p9), 0.0  }
   0xe   : > { %261 = sbr.rel (%p258_p9) target bundleno = 3918 (0xf4e), region = 48  ;;  %v2545_v2 = vld [vmem:[%s3677_s3 + $0x80] sm:$0xff] (!%p258_p9)  ;;  %2965 = vmatprep.subr.bf16.mxu1 (!%p258_p9), %v3183_v3  ;;  %v2957_v4 = vpack.c.bf16 (!%p258_p9), %v313_v1, %v312_v0  ;;  %v2546_v5 = vld [vmem:[%s3677_s3 + $0x88] sm:$0xff] (!%p258_p9)  ;;  %v315_v7 = vld [vmem:[%s3677_s3 + $0x18] sm:$0xff] (!%p258_p9)  ;;  %2784 = vmatprep.mubr.msk.f32.mxu1 (!%p258_p9), %vm3184_vm0, %v3185_v8  ;;  %p296_p10 = scmp.lt.s32.totalorder (!%p258_p9), %s3250_s28, 1  ;;  %vm323_vm1 = vcmask (!%p258_p9), 261120  }
   0xf   : > { %v2966_v9 = vpack.c.bf16 (!%p258_p9), %v2546_v5, %v2545_v2  ;;  %v2961_v10 = vpack.c.bf16 (!%p258_p9), %v315_v7, %v314_v6  ;;  %v2547_v11 = vld [vmem:[%s3677_s3 + $0x90] sm:$0xff] (!%p258_p9)  ;;  %v2548_v12 = vld [vmem:[%s3677_s3 + $0x98] sm:$0xff] (!%p258_p9)  ;;  %v2550_v17 = vld [vmem:[%s3678_s4 + $0x4] ss:$0 sm:$0xff] (!%p258_p9)  ;;  %vm581_vm2 = vcmask (!%p258_p9), 64512   ;;  %s293_s13 = sand.u32 (!%p258_p9), 1, %s3173_s25  }
  0x10   : > { %2958 = vmatprep.subr.bf16.mxu0 (!%p258_p9), %v2957_v4  ;;  %v2969_v13 = vpack.c.bf16 (!%p258_p9), %v2548_v12, %v2547_v11  ;;  %v2542_v18 = vld [vmem:[%s3678_s4] ss:$0 sm:$0xff] (!%p258_p9)  ;;  %v2553_v27 = vld [vmem:[%s3677_s3 + $0x108] sm:$0xff] (!%p258_p9)  ;;  %v2554_v28 = vld [vmem:[%s3677_s3 + $0x110] sm:$0xff] (!%p258_p9)  ;;  %s2538_s14 = sshll.u32 (!%p258_p9), %s293_s13, 4 }
  0x11   : > { %2967 = vmatpush3.bf16.msra.mxu1 (!%p258_p9), %v2966_v9  ;;  %2960 = vmatpush3.bf16.msra.mxu0 (!%p258_p9), %v2957_v4  ;;  %v2552_v26 = vld [vmem:[%s3677_s3 + $0x100] sm:$0xff] (!%p258_p9)  ;;  %v2555_v30 = vld [vmem:[%s3677_s3 + $0x118] sm:$0xff] (!%p258_p9)  ;;  %v2557_v49 = vld [vmem:[%s3678_s4 + $0x8] ss:$0 sm:$0xff] (!%p258_p9)  ;;  %s295_s18 = scalar_lea.vmem (!%p258_p9), [#allocation2], %s2538_s14 }
  0x12   : > { %2968 = vmatprep.subr.bf16.mxu1 (!%p258_p9), %v3183_v3  ;;  %2962 = vmatprep.subr.bf16.mxu0 (!%p258_p9), %v2961_v10  ;;  %v2972_v29 = vpack.c.bf16 (!%p258_p9), %v2553_v27, %v2552_v26  ;;  %v2975_v31 = vpack.c.bf16 (!%p258_p9), %v2555_v30, %v2554_v28  ;;  %v2565_v53 = vld [vmem:[%s3677_s3 + $0x20] sm:$0xff] (!%p258_p9)  ;;  %v2566_v54 = vld [vmem:[%s3677_s3 + $0x28] sm:$0xff] (!%p258_p9)  ;;  %v2567_v56 = vld [vmem:[%s3677_s3 + $0x30] sm:$0xff] (!%p258_p9)  ;;  %s2451_s19 = sshll.u32 (!%p258_p9), %s295_s18, 4  ;;  %s3629_s19 = int_to_ptr.vmem [resolvable:$true] %s2451_s19 }
  0x13   : > { %v2977_v55 = vpack.c.bf16 (!%p258_p9), %v2566_v54, %v2565_v53  ;;  %v2568_v57 = vld [vmem:[%s3677_s3 + $0x38] sm:$0xff] (!%p258_p9)  ;;  %v2580_v59 = vld [vmem:[%s3677_s3 + $0x120] sm:$0xff] (!%p258_p9)  ;;  %v2581_v60 = vld [vmem:[%s3677_s3 + $0x128] sm:$0xff] (!%p258_p9)  ;;  %s3119_s29 = scalar_lea.vmem (!%p258_p9), %s3629_s19, 256 }
  0x14   : > { %v2981_v58 = vpack.c.bf16 (!%p258_p9), %v2568_v57, %v2567_v56  ;;  %v2582_v61 = vld [vmem:[%s3677_s3 + $0x130] sm:$0xff] (!%p258_p9)  ;;  %v2992_v62 = vpack.c.bf16 (!%p258_p9), %v2581_v60, %v2580_v59  ;;  %v2583_v63 = vld [vmem:[%s3677_s3 + $0x138] sm:$0xff] (!%p258_p9)  ;;  %v2573_v6 = vld [vmem:[%s3677_s3 + $0xa0] sm:$0xff] (!%p258_p9)  ;;  %p3120_p11 = scmp.ne.s32.totalorder (!%p258_p9), %s3629_s19, %s3119_s29 }
  0x15   : > { %s3306_s15 = scalar_select %p296_p10, %s3250_s28, 1  ;;  %2970 = vmatpush3.bf16.msra.mxu1 %v2969_v13  ;;  %2964 = vmatpush3.bf16.msra.mxu0 %v2961_v10  ;;  %v2995_v0 = vpack.c.bf16 %v2583_v63, %v2582_v61  ;;  %v2574_v7 = vld [vmem:[%s3677_s3 + $0xa8] sm:$0xff]  ;;  %v2575_v12 = vld [vmem:[%s3677_s3 + $0xb0] sm:$0xff]  ;;  %v2576_v13 = vld [vmem:[%s3677_s3 + $0xb8] sm:$0xff] }
  0x16   : > { %2971 = vmatprep.subr.bf16.mxu0 %v3183_v3  ;;  %v2986_v10 = vpack.c.bf16 %v2574_v7, %v2573_v6  ;;  %v2578_v26 = vld [vmem:[%s3678_s4 + $0x5] ss:$0 sm:$0xff]  ;;  %v2606_v59 = vld [vmem:[%s3677_s3 + $0xc8] sm:$0xff]  ;;  %p3121_p12 = pnand %p3120_p11, %p3267_p5 }
  0x17   : > { %s2663_s16 = sshll.u32 %s3306_s15, 4  ;;  %s2541_s17 = sshll.u32 %s3306_s15, 3  ;;  %v2597_v61 = vld [vmem:[%s3677_s3 + $0x40] sm:$0xff] }
  0x18   : > { %s300_s20 = scalar_lea.vmem %s3674_s0, %s2663_s16  ;;  %s304_s23 = scalar_lea.vmem %s3675_s1, %s2541_s17 }
  0x19   : > { %v3317_v14 = vld [vmem:[%s300_s20] sm:$0xff]  ;;  %v3321_v16 = vld [vmem:[%s300_s20 + $0x8] sm:$0xff]  ;;  %s307_s8 = scalar_lea.vmem %s3676_s2, %s3306_s15  ;;  %s2664_s20 = sshll.u32 %s3250_s28, 8 }
  0x1a   : > { %v3319_v15 = vld [vmem:[%s304_s23] sm:$0xff]  ;;  %2773 = vmatprep.mubr.msk.f32.mxu0 %vm323_vm1, %v3317_v14  ;;  %s3627_s23 = scalar_lea.hbm %s3681_s7, %s2664_s20  ;;  %s3633_s28 = scalar_lea.sflag [#allocation3], %s293_s13 }
  0x1b   : > { %2785 = vmatmul.mubr.msk.f32.vlgmr.msra.gmra.mrb[0].mxu1 %vm323_vm1, %v3319_v15  ;;  %2774 = vmatmul.mubr.msk.f32.vlgmr.msra.gmra.mrb[0].mxu0 %vm323_vm1, %v3321_v16  ;;  %v3363_v32 = vld [vmem:[%s307_s8] ss:$0 sm:$0xff]  ;;  %p3122_p13 = pneg %p3121_p12  ;;  %s3186_s8 = smov [#allocation2]  }
  0x1c   : > { %2795 = vmatprep.mubr.msk.f32.mxu0 %vm3184_vm0, %v3185_v8  ;;  %2973 = vmatpush3.bf16.msra.mxu0 %v2972_v29  ;;  %s3123_s15 = sshll.u32 %s3186_s8, 4  ;;  %s3124_s15 = int_to_ptr.vmem [resolvable:$false] %s3123_s15 }
  0x1d   : > { %2974 = vmatprep.subr.bf16.mxu0 %v3183_v3  ;;  %s3125_s9 = scalar_lea.vmem %s3124_s15, 512  ;;  %p3126_p0 = scmp.lt.s32.totalorder %s3629_s19, %s3124_s15 }
  0x1e   : > { %p3127_p1 = scmp.lt.s32.totalorder %s3125_s9, %s3119_s29 }
  0x20   : > { %2976 = vmatpush3.bf16.msra.mxu0 %v2975_v31  ;;  %p3128_p2 = por %p3127_p1, %p3126_p0 }
  0x21   : > { %2978 = vmatprep.subr.bf16.mxu0 %v2977_v55 }
  0x22   : > { %p3129_p3 = pnand %p3128_p2, %p3122_p13 }
  0x23   : > { %2796 = vmatmul.mubr.msk.f32.vlgmr.msra.gmra.mrb[2].mxu0 %vm323_vm1, %v3319_v15 }
  0x24   : > { %2816 = vmatprep.mubr.msk.f32.mxu0 %vm323_vm1, %v3317_v14  ;;  %2980 = vmatpush3.bf16.msra.mxu0 %v2977_v55 }
  0x25   : > { %2982 = vmatprep.subr.bf16.mxu0 %v2981_v58 }
  0x28   : > { %2984 = vmatpush3.bf16.msra.mxu0 %v2981_v58  ;;  %v2605_v58 = vld [vmem:[%s3677_s3 + $0xc0] sm:$0xff] }
  0x29   : > { %2991 = vmatprep.subr.bf16.mxu0 %v3183_v3  ;;  %v3006_v60 = vpack.c.bf16 %v2606_v59, %v2605_v58  ;;  %v2627_v58 = vld [vmem:[%s3677_s3 + $0x60] sm:$0xff]  ;;  %v2628_v59 = vld [vmem:[%s3677_s3 + $0x68] sm:$0xff] }
  0x2b   : > { %2817 = vmatmul.mubr.msk.f32.vlgmr.msra.gmra.mrb[4].mxu0 %vm323_vm1, %v3321_v16 }
  0x2c   : > { %2838 = vmatprep.mubr.msk.f32.mxu0 %vm3184_vm0, %v3185_v8  ;;  %2993 = vmatpush3.bf16.msra.mxu0 %v2992_v62  ;;  %v2598_v62 = vld [vmem:[%s3677_s3 + $0x48] sm:$0xff] }
  0x2d   : > { %2994 = vmatprep.subr.bf16.mxu0 %v3183_v3  ;;  %v2997_v63 = vpack.c.bf16 %v2598_v62, %v2597_v61  ;;  %v2629_v61 = vld [vmem:[%s3677_s3 + $0x70] sm:$0xff]  ;;  %v2630_v62 = vld [vmem:[%s3677_s3 + $0x78] sm:$0xff] }
  0x30   : > { %2996 = vmatpush3.bf16.msra.mxu0 %v2995_v0  ;;  %v2607_v0 = vld [vmem:[%s3677_s3 + $0xd0] sm:$0xff] }
  0x33   : > { %2839 = vmatmul.mubr.msk.f32.vlgmr.msra.gmra.mrb[6].mxu0 %vm323_vm1, %v3319_v15 }
  0xee   : > { %v487_v19 = vpop.f32.mrb[0].mxu1  ;;  %v2775_v20 = vpop.f32.mrb[0].mxu0 }
  0xef   : > { %v488_v21 = vadd.f32 %v2550_v17, %v487_v19  ;;  %v2786_v22 = vpop.f32.mrb[1].mxu1  ;;  %v396_v23 = vpop.f32.mrb[1].mxu0  ;;  %v402_v25 = vadd.f32 %v2775_v20, %v2542_v18  ;;  %v2989_v17 = vpack.c.bf16 %v2576_v13, %v2575_v12  ;;  %v2570_v20 = vld [vmem:[%s3678_s4 + $0x1] ss:$0 sm:$0xff] }
  0xf0   : > { %v397_v24 = vadd.f32 %v2542_v18, %v396_v23  ;;  %v574_v18 = vld [vmem:[%s3679_s5] sm:$0xff] }
  0xf1   : > { %2798 = vmatprep.subr.msk.mxu1 %vm581_vm2, %v488_v21  ;;  %2856 = vmatprep.subr.mxu0 %v574_v18 }
  0xf2   : > { %2799 = vmatpush3.xpose.msk.msra.mxu1 %vm581_vm2, %v488_v21  ;;  %2800 = vmatprep.mubr.msk.f32.mxu1 %vm581_vm2, %v397_v24 }
  0xf3   : > { %2857 = vmatpush3.msra.mxu0 %v574_v18 }
  0xf4   : > { %3005 = vmatprep.subr.bf16.mxu0 %v3183_v3 }
  0xf5   : > { %2801 = vmatmul.mubr.msk.f32.vlgmr.msra.gmra.mrb[2].mxu1 %vm581_vm2, %v402_v25 }
  0xf6   : > { %v570_v50 = vpop.f32.mrb[2].mxu0 }
  0xf7   : > { %v571_v51 = vadd.f32 %v2557_v49, %v570_v50  ;;  %v2797_v52 = vpop.f32.mrb[3].mxu0 }
  0xf9   : > { %2803 = vmatprep.subr.mxu1 %v571_v51 }
  0xfa   : > { %2804 = vmatpush3.msra.mxu1 %v571_v51  ;;  %v2587_v51 = vld [vmem:[%s3679_s5 + $0x8] sm:$0xff] }
  0xfb   : > { %2985 = vmatprep.subr.bf16.mxu1 %v3183_v3 }
  0xfe   : > { %v2818_v19 = vpop.f32.mrb[4].mxu0 }
  0xff   : > { %v854_v21 = vadd.f32 %v2818_v19, %v2570_v20  ;;  %v848_v22 = vpop.f32.mrb[5].mxu0  ;;  %v2602_v19 = vld [vmem:[%s3678_s4 + $0x2] ss:$0 sm:$0xff] }
 0x100   : > { %v849_v23 = vadd.f32 %v2570_v20, %v848_v22 }
 0x1c8   : > { %v2802_v33 = vpop.f32.mrb[2].mxu1 }
 0x1c9   : > { %v657_v34 = vpop.f32.mrb[3].mxu1  ;;  %v663_v36 = vadd.f32 %v2802_v33, %v3363_v32 }
 0x1ca   : > { %v658_v35 = vadd.f32 %v3363_v32, %v657_v34 }
 0x1cb   : > { %v669_v38 = vsel %vm581_vm2, %v663_v36, -inf }
 0x1cc   : > { %v666_v37 = vsel %vm581_vm2, %v658_v35, -inf }
 0x1cd   : > { %667 = vmax.xlane.f32.xlu0 %v666_v37 }
 0x1d1   : > { %670 = vmax.xlane.f32.xlu0 %v669_v38 }
 0x25a   : > { %v668_v39 = vpop.xlane.xlu0 %667 }
 0x25b   : > { %v672_v40 = vsub.f32 %v658_v35, %v668_v39 }
 0x25d   : > { %v674_v41 = vmul.f32 1.442695, %v672_v40 }
 0x25e   : > { %v671_v42 = vpop.xlane.xlu0 %670 }
 0x25f   : > { %3087 = vpow2.f32 %v674_v41  ;;  %v673_v43 = vsub.f32 %v663_v36, %v671_v42 }
 0x261   : > { %v676_v44 = vmul.f32 1.442695, %v673_v43 }
 0x263   : > { %3089 = vpow2.f32 %v676_v44 }
 0x269   : > { %v3088_v45 = vpop.eup %3087 }
 0x26a   : > { %v678_v46 = vsel %vm581_vm2, %v3088_v45, 0.0 }
 0x26b   : > { %679 = vadd.xlane.f32.xlu1 %v678_v46 }
 0x26d   : > { %v3090_v47 = vpop.eup %3089 }
 0x26e   : > { %v681_v48 = vsel %vm581_vm2, %v3090_v47, 0.0 }
 0x26f   : > { %682 = vadd.xlane.f32.xlu1 %v681_v48  ;;  %v1019_v48 = vpop.f32.mrb[6].mxu0 }
 0x270   : > { %v2840_v50 = vpop.f32.mrb[7].mxu0 }
 0x2f8   : > { %v680_v1 = vpop.xlane.xlu1 %679 }
 0x2f9   : > { %3091 = vrcp.f32 %v680_v1  ;;  %v2608_v1 = vld [vmem:[%s3677_s3 + $0xd8] sm:$0xff] }
 0x2fc   : > { %v683_v2 = vpop.xlane.xlu1 %682 }
 0x2fd   : > { %3093 = vrcp.f32 %v683_v2  ;;  %v3009_v2 = vpack.c.bf16 %v2608_v1, %v2607_v0  ;;  %v2636_v0 = vld [vmem:[%s3677_s3 + $0xe8] sm:$0xff] }
 0x303   : > { %v3092_v4 = vpop.eup %3091 }
 0x304   : > { %v686_v5 = vmul.f32 %v3092_v4, %v3088_v45  ;;  %v2599_v4 = vld [vmem:[%s3677_s3 + $0x50] sm:$0xff] }
 0x306   : > { %2805 = vmatprep.mubr.msk.f32.mxu1 %vm581_vm2, %v686_v5  ;;  %v2600_v5 = vld [vmem:[%s3677_s3 + $0x58] sm:$0xff] }
 0x307   : > { %v3094_v9 = vpop.eup %3093 }
 0x308   : > { %v687_v11 = vmul.f32 %v3094_v9, %v3090_v47  ;;  %v2585_v47 = vld [vmem:[%s3678_s4 + $0x9] ss:$0 sm:$0xff]  ;;  %v3001_v9 = vpack.c.bf16 %v2600_v5, %v2599_v4  ;;  %v2637_v5 = vld [vmem:[%s3677_s3 + $0xf0] sm:$0xff] }
 0x309   : > { %v1020_v49 = vadd.f32 %v2585_v47, %v1019_v48  ;;  %v2617_v47 = vld [vmem:[%s3678_s4 + $0xa] ss:$0 sm:$0xff] }
 0x30a   : > { %2806 = vmatmul.mubr.msk.f32.vlgmr.msra.gmra.mrb[4].mxu1 %vm581_vm2, %v687_v11 }
 0x30b   : > { %2987 = vmatpush3.bf16.msra.mxu1 %v2986_v10  ;;  %2827 = vmatprep.mubr.msk.f32.mxu1 %vm3184_vm0, %v3185_v8  ;;  %v2610_v10 = vld [vmem:[%s3678_s4 + $0x6] ss:$0 sm:$0xff] }
 0x30c   : > { %2988 = vmatprep.subr.bf16.mxu1 %v3183_v3 }
 0x30f   : > { %2990 = vmatpush3.bf16.msra.mxu1 %v2989_v17 }
 0x312   : > { %2828 = vmatmul.mubr.msk.f32.vlgmr.msra.gmra.mrb[6].mxu1 %vm323_vm1, %v3319_v15 }
 0x313   : > { %2843 = vmatprep.mubr.msk.f32.mxu1 %vm581_vm2, %v849_v23 }
 0x3dd   : > { %v2807_v24 = vpop.f32.mrb[4].mxu1 }
 0x3de   : > { %v760_v25 = vpop.f32.mrb[5].mxu1 }
 0x3df   : > { %2858 = vmatprep.mubr.msk.f32.mxu0 %vm581_vm2, %v760_v25  ;;  %v2613_v25 = vld [vmem:[%s3677_s3 + $0x148] sm:$0xff] }
 0x3e0   : > { %2859 = vmatmul.mubr.msk.f32.vlgmr.msra.gmra.mrb[8].mxu0 %vm581_vm2, %v2807_v24  ;;  %v2612_v24 = vld [vmem:[%s3677_s3 + $0x140] sm:$0xff] }
 0x3e1   : > { %2880 = vmatprep.mubr.msk.f32.mxu0 %vm3184_vm0, %v3185_v8  ;;  %3007 = vmatpush3.bf16.msra.mxu0 %v3006_v60  ;;  %v3017_v60 = vpack.c.bf16 %v2628_v59, %v2627_v58 }
 0x3e2   : > { %3008 = vmatprep.subr.bf16.mxu0 %v3183_v3 }
 0x3e5   : > { %v936_v27 = vpop.f32.mrb[6].mxu1  ;;  %3010 = vmatpush3.bf16.msra.mxu0 %v3009_v2 }
 0x3e6   : > { %v937_v28 = vadd.f32 %v2578_v26, %v936_v27  ;;  %v2829_v29 = vpop.f32.mrb[7].mxu1  ;;  %v2614_v26 = vld [vmem:[%s3677_s3 + $0x150] sm:$0xff]  ;;  %v3012_v27 = vpack.c.bf16 %v2613_v25, %v2612_v24  ;;  %v2645_v25 = vld [vmem:[%s3677_s3 + $0x178] sm:$0xff] }
 0x3e8   : > { %2841 = vmatprep.subr.msk.mxu1 %vm581_vm2, %v937_v28  ;;  %2881 = vmatmul.mubr.msk.f32.vlgmr.msra.gmra.mrb[10].mxu0 %vm323_vm1, %v3319_v15 }
 0x3e9   : > { %2842 = vmatpush3.xpose.msk.msra.mxu1 %vm581_vm2, %v937_v28  ;;  %v2615_v28 = vld [vmem:[%s3677_s3 + $0x158] sm:$0xff] }
 0x3ea   : > { %2846 = vmatprep.subr.mxu1 %v1020_v49  ;;  %v3015_v29 = vpack.c.bf16 %v2615_v28, %v2614_v26 }
 0x3ec   : > { %2844 = vmatmul.mubr.msk.f32.vlgmr.msra.gmra.mrb[8].mxu1 %vm581_vm2, %v854_v21 }
 0x3ed   : > { %2847 = vmatpush3.msra.mxu1 %v1020_v49 }
 0x3ee   : > { %2851 = vmatprep.subr.mxu1 %v2587_v51 }
 0x4bb   : > { %v1541_v11 = vpop.f32.mrb[10].mxu0 }
 0x4bc   : > { %v1542_v12 = vadd.f32 %v2610_v10, %v1541_v11  ;;  %v2882_v13 = vpop.f32.mrb[11].mxu0 }
 0x4be   : > { %2894 = vmatprep.subr.msk.mxu0 %vm581_vm2, %v1542_v12 }
 0x4bf   : > { %v2845_v30 = vpop.f32.mrb[8].mxu1  ;;  %2895 = vmatpush3.xpose.msk.msra.mxu0 %vm581_vm2, %v1542_v12 }
 0x4c0   : > { %v1106_v31 = vadd.f32 %v2845_v30, %v3363_v32  ;;  %v1100_v33 = vpop.f32.mrb[9].mxu1 }
 0x4c1   : > { %v1101_v34 = vadd.f32 %v3363_v32, %v1100_v33 }
 0x4c2   : > { %v1112_v35 = vsel %vm581_vm2, %v1106_v31, -inf }
 0x4c3   : > { %1113 = vmax.xlane.f32.xlu1 %v1112_v35  ;;  %v1109_v36 = vsel %vm581_vm2, %v1101_v34, -inf }
 0x4c4   : > { %1110 = vmax.xlane.f32.xlu0 %v1109_v36 }
 0x550   : > { %v1114_v37 = vpop.xlane.xlu1 %1113 }
 0x551   : > { %v1116_v38 = vsub.f32 %v1106_v31, %v1114_v37  ;;  %v1111_v39 = vpop.xlane.xlu0 %1110 }
 0x552   : > { %v1115_v40 = vsub.f32 %v1101_v34, %v1111_v39 }
 0x553   : > { %v1119_v41 = vmul.f32 1.442695, %v1116_v38 }
 0x554   : > { %v1117_v42 = vmul.f32 1.442695, %v1115_v40 }
 0x555   : > { %3095 = vpow2.f32 %v1119_v41 }
 0x556   : > { %3097 = vpow2.f32 %v1117_v42 }
 0x55f   : > { %v3096_v43 = vpop.eup %3095 }
 0x560   : > { %v3098_v44 = vpop.eup %3097  ;;  %v1124_v45 = vsel %vm581_vm2, %v3096_v43, 0.0 }
 0x561   : > { %1125 = vadd.xlane.f32.xlu1 %v1124_v45  ;;  %v1121_v46 = vsel %vm581_vm2, %v3098_v44, 0.0 }
 0x562   : > { %1122 = vadd.xlane.f32.xlu0 %v1121_v46 }
 0x5ee   : > { %v1126_v52 = vpop.xlane.xlu1 %1125 }
 0x5ef   : > { %3099 = vrcp.f32 %v1126_v52  ;;  %v1123_v53 = vpop.xlane.xlu0 %1122 }
 0x5f0   : > { %3101 = vrcp.f32 %v1123_v53 }
 0x5f9   : > { %v3100_v54 = vpop.eup %3099 }
 0x5fa   : > { %v3102_v55 = vpop.eup %3101  ;;  %v1130_v57 = vmul.f32 %v3100_v54, %v3096_v43 }
 0x5fb   : > { %v1129_v56 = vmul.f32 %v3102_v55, %v3098_v44 }
 0x5fd   : > { %2848 = vmatprep.mubr.msk.f32.mxu1 %vm581_vm2, %v1129_v56 }
 0x5fe   : > { %2849 = vmatmul.mubr.msk.f32.vlgmr.msra.gmra.mrb[10].mxu1 %vm581_vm2, %v1130_v57 }
 0x5ff   : > { %2852 = vmatpush3.msra.mxu1 %v2587_v51  ;;  %v2619_v51 = vld [vmem:[%s3679_s5 + $0x10] sm:$0xff] }
 0x600   : > { %2998 = vmatprep.subr.bf16.mxu1 %v2997_v63  ;;  %2904 = vmatprep.subr.mxu0 %v2619_v51 }
 0x6d1   : > { %v2850_v6 = vpop.f32.mrb[10].mxu1 }
 0x6d2   : > { %v1203_v7 = vpop.f32.mrb[11].mxu1 }
 0x6d3   : > { %2853 = vmatprep.mubr.msk.f32.mxu1 %vm581_vm2, %v1203_v7  ;;  %v2632_v7 = vld [vmem:[%s3678_s4 + $0x3] ss:$0 sm:$0xff] }
 0x6d4   : > { %2854 = vmatmul.mubr.msk.f32.vlgmr.msra.gmra.mrb[12].mxu1 %vm581_vm2, %v2850_v6 }
 0x6d5   : > { %3000 = vmatpush3.bf16.msra.mxu1 %v2997_v63  ;;  %2869 = vmatprep.mubr.msk.f32.mxu1 %vm323_vm1, %v3317_v14  ;;  %v2635_v63 = vld [vmem:[%s3677_s3 + $0xe0] sm:$0xff] }
 0x6d6   : > { %3002 = vmatprep.subr.bf16.mxu1 %v3001_v9  ;;  %v3026_v2 = vpack.c.bf16 %v2636_v0, %v2635_v63 }
 0x6d9   : > { %3004 = vmatpush3.bf16.msra.mxu1 %v3001_v9 }
 0x6da   : > { %3011 = vmatprep.subr.bf16.mxu1 %v3183_v3 }
 0x6dc   : > { %2870 = vmatmul.mubr.msk.f32.vlgmr.msra.gmra.mrb[14].mxu1 %vm323_vm1, %v3321_v16 }
 0x6dd   : > { %2891 = vmatprep.mubr.msk.f32.mxu1 %vm3184_vm0, %v3185_v8  ;;  %3013 = vmatpush3.bf16.msra.mxu1 %v3012_v27 }
 0x6de   : > { %3014 = vmatprep.subr.bf16.mxu1 %v3183_v3 }
 0x6e1   : > { %3016 = vmatpush3.bf16.msra.mxu1 %v3015_v29 }
 0x6e4   : > { %2892 = vmatmul.mubr.msk.f32.vlgmr.msra.gmra.mrb[16].mxu1 %vm323_vm1, %v3319_v15 }
 0x7a7   : > { %v3499_v17 = vpop.f32.mrb[12].mxu1 }
 0x7a8   : > { %v3501_v18 = vpop.f32.mrb[13].mxu1 }
 0x7af   : > { %v2871_v20 = vpop.f32.mrb[14].mxu1 }
 0x7b0   : > { %v1453_v21 = vpop.f32.mrb[15].mxu1  ;;  %v1459_v23 = vadd.f32 %v2871_v20, %v2602_v19 }
 0x7b1   : > { %v1454_v22 = vadd.f32 %v2602_v19, %v1453_v21  ;;  %v2642_v21 = vld [vmem:[%s3677_s3 + $0x160] sm:$0xff] }
 0x7b3   : > { %2896 = vmatprep.mubr.msk.f32.mxu0 %vm581_vm2, %v1454_v22  ;;  %v2643_v22 = vld [vmem:[%s3677_s3 + $0x168] sm:$0xff] }
 0x7b4   : > { %2897 = vmatmul.mubr.msk.f32.vlgmr.msra.gmra.mrb[12].mxu0 %vm581_vm2, %v1459_v23  ;;  %v2644_v23 = vld [vmem:[%s3677_s3 + $0x170] sm:$0xff]  ;;  %v3032_v24 = vpack.c.bf16 %v2643_v22, %v2642_v21 }
 0x7b5   : > { %2905 = vmatpush3.msra.mxu0 %v2619_v51  ;;  %v3035_v26 = vpack.c.bf16 %v2645_v25, %v2644_v23 }
 0x7b6   : > { %3025 = vmatprep.subr.bf16.mxu0 %v3183_v3 }
 0x7b7   : > { %v1624_v48 = vpop.f32.mrb[16].mxu1 }
 0x7b8   : > { %v1625_v49 = vadd.f32 %v2617_v47, %v1624_v48  ;;  %v2893_v50 = vpop.f32.mrb[17].mxu1 }
 0x7ba   : > { %2899 = vmatprep.subr.mxu1 %v1625_v49 }
 0x7bb   : > { %2900 = vmatpush3.msra.mxu1 %v1625_v49 }
 0x7bc   : > { %3018 = vmatprep.subr.bf16.mxu1 %v3017_v60 }
 0x887   : > { %v2898_v30 = vpop.f32.mrb[12].mxu0 }
 0x888   : > { %v1711_v31 = vadd.f32 %v2898_v30, %v3363_v32  ;;  %v1705_v33 = vpop.f32.mrb[13].mxu0 }
 0x889   : > { %v1706_v34 = vadd.f32 %v3363_v32, %v1705_v33 }
 0x88a   : > { %v1717_v35 = vsel %vm581_vm2, %v1711_v31, -inf }
 0x88b   : > { %1718 = vmax.xlane.f32.xlu1 %v1717_v35  ;;  %v1714_v36 = vsel %vm581_vm2, %v1706_v34, -inf }
 0x88c   : > { %1715 = vmax.xlane.f32.xlu0 %v1714_v36 }
 0x918   : > { %v1719_v37 = vpop.xlane.xlu1 %1718 }
 0x919   : > { %v1721_v38 = vsub.f32 %v1711_v31, %v1719_v37  ;;  %v1716_v39 = vpop.xlane.xlu0 %1715 }
 0x91a   : > { %v1720_v40 = vsub.f32 %v1706_v34, %v1716_v39 }
 0x91b   : > { %v1724_v41 = vmul.f32 1.442695, %v1721_v38 }
 0x91c   : > { %v1722_v42 = vmul.f32 1.442695, %v1720_v40 }
 0x91d   : > { %3103 = vpow2.f32 %v1724_v41  ;;  %v2647_v41 = vld [vmem:[%s3678_s4 + $0xb] ss:$0 sm:$0xff] }
 0x91e   : > { %3105 = vpow2.f32 %v1722_v42 }
 0x927   : > { %v3104_v43 = vpop.eup %3103 }
 0x928   : > { %v3106_v44 = vpop.eup %3105  ;;  %v1729_v45 = vsel %vm581_vm2, %v3104_v43, 0.0 }
 0x929   : > { %1730 = vadd.xlane.f32.xlu1 %v1729_v45  ;;  %v1726_v46 = vsel %vm581_vm2, %v3106_v44, 0.0  ;;  %v2649_v45 = vld [vmem:[%s3679_s5 + $0x18] sm:$0xff] }
 0x92a   : > { %1727 = vadd.xlane.f32.xlu0 %v1726_v46 }
 0x9b6   : > { %v1731_v52 = vpop.xlane.xlu1 %1730 }
 0x9b7   : > { %3107 = vrcp.f32 %v1731_v52  ;;  %v1728_v53 = vpop.xlane.xlu0 %1727 }
 0x9b8   : > { %3109 = vrcp.f32 %v1728_v53 }
 0x9c1   : > { %v3108_v54 = vpop.eup %3107 }
 0x9c2   : > { %v3110_v55 = vpop.eup %3109  ;;  %v1735_v57 = vmul.f32 %v3108_v54, %v3104_v43 }
 0x9c3   : > { %v1734_v56 = vmul.f32 %v3110_v55, %v3106_v44  ;;  %v2657_v55 = vld [vmem:[%s3680_s6] ss:$0 sm:$0xff] }
 0x9c5   : > { %2901 = vmatprep.mubr.msk.f32.mxu1 %vm581_vm2, %v1734_v56 }
 0x9c6   : > { %2902 = vmatmul.mubr.msk.f32.vlgmr.msra.gmra.mrb[18].mxu1 %vm581_vm2, %v1735_v57 }
 0x9c7   : > { %2917 = vmatprep.mubr.msk.f32.mxu1 %vm323_vm1, %v3317_v14  ;;  %3020 = vmatpush3.bf16.msra.mxu1 %v3017_v60  ;;  %v3021_v14 = vpack.c.bf16 %v2630_v62, %v2629_v61 }
 0x9c9   : > { %3022 = vmatprep.subr.bf16.mxu1 %v3021_v14 }
 0x9cb   : > { %3024 = vmatpush3.bf16.msra.mxu1 %v3021_v14 }
 0x9cc   : > { %3031 = vmatprep.subr.bf16.mxu1 %v3183_v3 }
 0x9ce   : > { %2918 = vmatmul.mubr.msk.f32.vlgmr.msra.gmra.mrb[20].mxu1 %vm323_vm1, %v3321_v16  ;;  %v2638_v16 = vld [vmem:[%s3677_s3 + $0xf8] sm:$0xff] }
 0x9cf   : > { %2939 = vmatprep.mubr.msk.f32.mxu1 %vm3184_vm0, %v3185_v8  ;;  %v3029_v6 = vpack.c.bf16 %v2638_v16, %v2637_v5  ;;  %3033 = vmatpush3.bf16.msra.mxu1 %v3032_v24 }
 0x9d0   : > { %3034 = vmatprep.subr.bf16.mxu1 %v3183_v3 }
 0x9d3   : > { %3036 = vmatpush3.bf16.msra.mxu1 %v3035_v26 }
 0x9d6   : > { %2940 = vmatmul.mubr.msk.f32.vlgmr.msra.gmra.mrb[22].mxu1 %vm323_vm1, %v3319_v15 }
 0xa99   : > { %v2903_v1 = vpop.f32.mrb[18].mxu1 }
 0xa9a   : > { %v1808_v4 = vpop.f32.mrb[19].mxu1 }
 0xa9b   : > { %2906 = vmatprep.mubr.msk.f32.mxu0 %vm581_vm2, %v1808_v4 }
 0xa9c   : > { %2907 = vmatmul.mubr.msk.f32.vlgmr.msra.gmra.mrb[8].mxu0 %vm581_vm2, %v2903_v1 }
 0xa9d   : > { %3027 = vmatpush3.bf16.msra.mxu0 %v3026_v2  ;;  %2928 = vmatprep.mubr.msk.f32.mxu0 %vm3184_vm0, %v3185_v8  ;;  %v2640_v8 = vld [vmem:[%s3678_s4 + $0x7] ss:$0 sm:$0xff] }
 0xa9e   : > { %3028 = vmatprep.subr.bf16.mxu0 %v3183_v3 }
 0xaa1   : > { %3030 = vmatpush3.bf16.msra.mxu0 %v3029_v6  ;;  %v2919_v9 = vpop.f32.mrb[20].mxu1 }
 0xaa2   : > { %v1985_v10 = vadd.f32 %v2919_v9, %v2632_v7  ;;  %v1979_v11 = vpop.f32.mrb[21].mxu1 }
 0xaa3   : > { %v1980_v12 = vadd.f32 %v2632_v7, %v1979_v11 }
 0xaa4   : > { %2929 = vmatmul.mubr.msk.f32.vlgmr.msra.gmra.mrb[14].mxu0 %vm323_vm1, %v3319_v15 }
 0xaa5   : > { %2944 = vmatprep.mubr.msk.f32.mxu0 %vm581_vm2, %v1980_v12 }
 0xaa9   : > { %v2150_v42 = vpop.f32.mrb[22].mxu1 }
 0xaaa   : > { %v2151_v43 = vadd.f32 %v2647_v41, %v2150_v42  ;;  %v2941_v44 = vpop.f32.mrb[23].mxu1 }
 0xb77   : > { %v2067_v13 = vpop.f32.mrb[14].mxu0 }
 0xb78   : > { %v2068_v19 = vadd.f32 %v2640_v8, %v2067_v13  ;;  %v2930_v20 = vpop.f32.mrb[15].mxu0 }
 0xb7a   : > { %2942 = vmatprep.subr.msk.mxu0 %vm581_vm2, %v2068_v19 }
 0xb7b   : > { %2943 = vmatpush3.xpose.msk.msra.mxu0 %vm581_vm2, %v2068_v19 }
 0xb7c   : > { %2947 = vmatprep.subr.mxu0 %v2151_v43 }
 0xb7e   : > { %2945 = vmatmul.mubr.msk.f32.vlgmr.msra.gmra.mrb[16].mxu0 %vm581_vm2, %v1985_v10 }
 0xb7f   : > { %2948 = vmatpush3.msra.mxu0 %v2151_v43 }
 0xb80   : > { %2952 = vmatprep.subr.mxu0 %v2649_v45 }
 0xc51   : > { %v2946_v27 = vpop.f32.mrb[16].mxu0 }
 0xc52   : > { %v2237_v28 = vadd.f32 %v2946_v27, %v3363_v32  ;;  %v2231_v29 = vpop.f32.mrb[17].mxu0 }
 0xc53   : > { %v2232_v30 = vadd.f32 %v3363_v32, %v2231_v29 }
 0xc54   : > { %v2243_v31 = vsel %vm581_vm2, %v2237_v28, -inf }
 0xc55   : > { %2244 = vmax.xlane.f32.xlu1 %v2243_v31  ;;  %v2240_v33 = vsel %vm581_vm2, %v2232_v30, -inf }
 0xc56   : > { %2241 = vmax.xlane.f32.xlu0 %v2240_v33 }
 0xce2   : > { %v2245_v34 = vpop.xlane.xlu1 %2244 }
 0xce3   : > { %v2247_v35 = vsub.f32 %v2237_v28, %v2245_v34  ;;  %v2242_v36 = vpop.xlane.xlu0 %2241 }
 0xce4   : > { %v2246_v3 = vsub.f32 %v2232_v30, %v2242_v36 }
 0xce5   : > { %v2250_v37 = vmul.f32 1.442695, %v2247_v35 }
 0xce6   : > { %v2248_v38 = vmul.f32 1.442695, %v2246_v3 }
 0xce7   : > { %3111 = vpow2.f32 %v2250_v37 }
 0xce8   : > { %3113 = vpow2.f32 %v2248_v38 }
 0xcf1   : > { %v3112_v15 = vpop.eup %3111 }
 0xcf2   : > { %v3114_v39 = vpop.eup %3113  ;;  %v2255_v40 = vsel %vm581_vm2, %v3112_v15, 0.0 }
 0xcf3   : > { %2256 = vadd.xlane.f32.xlu1 %v2255_v40  ;;  %v2252_v32 = vsel %vm581_vm2, %v3114_v39, 0.0 }
 0xcf4   : > { %2253 = vadd.xlane.f32.xlu0 %v2252_v32 }
 0xd80   : > { %v2257_v46 = vpop.xlane.xlu1 %2256 }
 0xd81   : > { %3115 = vrcp.f32 %v2257_v46  ;;  %v2254_v47 = vpop.xlane.xlu0 %2253 }
 0xd82   : > { %3117 = vrcp.f32 %v2254_v47 }
 0xd8b   : > { %v3116_v48 = vpop.eup %3115 }
 0xd8c   : > { %v3118_v49 = vpop.eup %3117  ;;  %v2261_v51 = vmul.f32 %v3116_v48, %v3112_v15 }
 0xd8d   : > { %v2260_v50 = vmul.f32 %v3118_v49, %v3114_v39 }
 0xd8f   : > { %2949 = vmatprep.mubr.msk.f32.mxu0 %vm581_vm2, %v2260_v50 }
 0xd90   : > { %2950 = vmatmul.mubr.msk.f32.vlgmr.msra.gmra.mrb[18].mxu0 %vm581_vm2, %v2261_v51 }
 0xd91   : > { %2953 = vmatpush3.msra.mxu0 %v2649_v45 }
 0xe63   : > { %v2951_v52 = vpop.f32.mrb[18].mxu0 }
 0xe64   : > { %v2334_v53 = vpop.f32.mrb[19].mxu0 }
 0xe65   : > { %2954 = vmatprep.mubr.msk.f32.mxu0 %vm581_vm2, %v2334_v53 }
 0xe66   : > { %2955 = vmatmul.mubr.msk.f32.vlgmr.msra.gmra.mrb[8].mxu0 %vm581_vm2, %v2951_v52 }
 0xf39   : > { %v2956_v54 = vpop.f32.mrb[8].mxu0 }
 0xf3a   : > { %v3037_v56 = vadd.f32 %v2956_v54, %v3499_v17  ;;  %v2415_v57 = vpop.f32.mrb[9].mxu0 }
 0xf3b   : > { %v3038_v58 = vadd.f32 %v2415_v57, %v3501_v18 }
 0xf3c   : > { %v2434_v59 = vadd.f32 %v3037_v56, %v2657_v55 }
 0xf3d   : > { %v2433_v60 = vadd.f32 %v3038_v58, %v2657_v55 }
 0xf3e   : > { %2436 = vst.msk [vmem:[%s295_s18 + $0x8] sm:$0xff] %vm323_vm1, %v2434_v59 }
 0xf3f   : > { %2435 = vst.msk [vmem:[%s295_s18] sm:$0xff] %vm323_vm1, %v2433_v60 }
 0xf40   : > { %3132 = shalt.err (!%p3129_p3)
}
 0xf41   : > { %s3133_s13 = scalar_lea.hbm %s3627_s23, 256  ;;  %s3137_s17 = scalar_lea.hbm %s3681_s7, 512 }
 0xf42   : > { %p3134_p4 = scmp.ne.s32.totalorder %s3627_s23, %s3133_s13  ;;  %p3138_p9 = scmp.lt.u32.totalorder %s3627_s23, %s3681_s7 }
 0xf43   : > { %p3139_p10 = scmp.lt.u32.totalorder %s3137_s17, %s3133_s13  ;;  %p3141_p12 = scmp.lt.u32.totalorder %s3133_s13, %s3627_s23 }
 0xf44   : > { %p3135_p7 = pnand %p3134_p4, %p3267_p5 }
 0xf45   : > { %p3140_p11 = por %p3139_p10, %p3138_p9 }
 0xf46   : > { %p3136_p8 = pneg %p3135_p7 }
 0xf47   : > { %p3142_p13 = por %p3141_p12, %p3140_p11 }
 0xf49   : > { %p3143_p0 = pnand %p3142_p13, %p3136_p8 }
 0xf4b   : > { %3146 = shalt.err (!%p3143_p0)
}
 0xf4c   : > { %s3187_s21 = smov 128   ;;  %s3188_s22 = smov 8  }
 0xf4d   : > { %3043 = dma.vmem_to_hbm [thread:$0]  (%p3267_p5), %s3629_s19, 256, %s3627_s23, %s3633_s28, %s3187_s21, %s3187_s21, %s3188_s22  }
 0xf4e PF: > { %p3049_p1 = scmp.ge.s32.totalorder %s3181_s27, 2  ;;  %s2466_s29 = sand.u32 1, %s3169_s24  }
 0xf4f   : > { %s2467_s8 = scalar_lea.sflag [#allocation3], %s2466_s29 }
 0xf50   : > { %p3046_p2 = pnand %p3049_p1, %p3271_p6 }
 0xf52   : > { %3164 = dma.done.wait (!%p3046_p2), %s2467_s8, 256  }
 0xf53   : > { %3166 = vsyncadd (!%p3046_p2), %s2467_s8, 4294967040  ;;  %p17_p3 = scmp.ge.s32.totalorder %s3254_s30, 4   ;;  %s3684_s24 = smov %s3173_s25 }
 0xf54   : > { %s3685_s25 = smov %s3177_s26  ;;  %s3686_s26 = smov %s3265_s10 }
 0xf55   : > { %s3687_s27 = smov %s3254_s30  ;;  %19 = sbr.rel (!%p17_p3) target bundleno = 3 (0x3), region = 114 }
 0xf5c   :  { %2472 = vsyncpa [#allocation3], 1 }
 0xf5d   :  { %2474 = vsyncpa [#allocation3 + $0x1], 1 }

</bundles_post_ra>
